<compile_context>
chip_gen: v7x
topology: tpu7x:2x2x1
jax: 0.10.0
libtpu: 0.0.40
codegen_flags: <defaults>
</compile_context>

<pallas_src>
import numpy as np
import jax
import jax.numpy as jnp
from jax import lax
from jax.experimental import pallas as pl
from jax.experimental.pallas import tpu as pltpu


# ---------------------------------------------------------------------------
# Scattering filter bank (deterministic numpy construction, kymatio-style).
# ---------------------------------------------------------------------------
def _gabor_2d(M, N, sigma, theta, xi, slant=1.0):
    R = np.array([[np.cos(theta), -np.sin(theta)],
                  [np.sin(theta),  np.cos(theta)]])
    R_inv = np.array([[np.cos(theta),  np.sin(theta)],
                      [-np.sin(theta), np.cos(theta)]])
    D = np.array([[1.0, 0.0], [0.0, slant * slant]])
    curv = R @ D @ R_inv / (2.0 * sigma * sigma)
    gab = np.zeros((M, N), np.complex128)
    for ex in [-2, -1, 0, 1, 2]:
        for ey in [-2, -1, 0, 1, 2]:
            xx, yy = np.mgrid[ex * M:M + ex * M, ey * N:N + ey * N]
            arg = (-(curv[0, 0] * xx * xx
                     + (curv[0, 1] + curv[1, 0]) * xx * yy
                     + curv[1, 1] * yy * yy)
                   + 1j * (xx * xi * np.cos(theta) + yy * xi * np.sin(theta)))
            gab = gab + np.exp(arg)
    gab = gab / (2.0 * np.pi * sigma * sigma / slant)
    return gab


def _morlet_2d(M, N, sigma, theta, xi, slant=0.5):
    wv = _gabor_2d(M, N, sigma, theta, xi, slant)
    wv_mod = _gabor_2d(M, N, sigma, theta, 0.0, slant)
    K = np.sum(wv) / np.sum(wv_mod)
    return wv - K * wv_mod


def build_scattering_filters(M, N, J, L):
    phi = _gabor_2d(M, N, 0.8 * 2 ** (J - 1), 0.0, 0.0, 1.0)
    phi_f = np.real(np.fft.fft2(phi)).astype(np.float32)
    psi_f = {}
    for j in range(J):
        for t in range(L):
            theta = (int(L - L / 2 - 1) - t) * np.pi / L
            psi = _morlet_2d(M, N, 0.8 * 2 ** j, theta,
                             3.0 / 4.0 * np.pi / 2 ** j, 4.0 / L)
            psi_f[(j, t)] = np.fft.fft2(psi).astype(np.complex64)
    return phi_f, psi_f


def scattering2d(x, J, L, max_order, phi_f, psi_f, out_dtype=jnp.float32):
    """x: (N, C, H, W) float32 -> (N, C, K, H/2^J, W/2^J) in out_dtype."""
    # TODO(synk): kymatio additionally uses reflection padding + unpadding
    # around the FFT convolutions; periodic boundaries are used here.
    k = 2 ** J
    xf = jnp.fft.fft2(x.astype(jnp.complex64))

    def lowpass_sub(uf):
        s = jnp.real(jnp.fft.ifft2(uf * phi_f))
        # Cast before stacking so the coefficient tensor is materialized once
        # directly in out_dtype (bf16 -> 2 B/elem activation stream).
        return s[..., ::k, ::k].astype(out_dtype)

    order0 = [lowpass_sub(xf)]
    order1, order2 = [], []
    for j1 in range(J):
        for t1 in range(L):
            u1 = jnp.abs(jnp.fft.ifft2(xf * psi_f[(j1, t1)]))
            u1f = jnp.fft.fft2(u1.astype(jnp.complex64))
            order1.append(lowpass_sub(u1f))
            if max_order >= 2:
                for j2 in range(j1 + 1, J):
                    for t2 in range(L):
                        u2 = jnp.abs(jnp.fft.ifft2(u1f * psi_f[(j2, t2)]))
                        u2f = jnp.fft.fft2(u2.astype(jnp.complex64))
                        order2.append(lowpass_sub(u2f))
    return jnp.stack(order0 + order1 + order2, axis=2)


# ---------------------------------------------------------------------------
# Alpha-expansion helpers (deterministic via np.random.seed in __main__)
# ---------------------------------------------------------------------------
def random_postconv_impulse(C, F):
    z = np.zeros((F, C, 3, 3), np.float32)
    x = np.random.randint(-1, 2, size=(F, C))
    y = np.random.randint(-1, 2, size=(F, C))
    for i in range(F):
        for j in range(C):
            z[i, j, y[i, j], x[i, j]] = 1.0
    return jnp.asarray(z)


def random_postconv_smooth(C, F, sigma=1):
    x = np.arange(-2, 3)
    a = 1.0 / np.sqrt(2 * np.pi * sigma ** 2) * np.exp(-x ** 2 / sigma ** 2)
    b = np.outer(a, a)
    z = np.zeros((F, C, 3, 3))
    x = np.random.randint(-1, 2, size=(F, C))
    y = np.random.randint(-1, 2, size=(F, C))
    for i in range(F):
        for j in range(C):
            z[i, j] = np.roll(b, (y[i, j], x[i, j]), axis=(0, 1))[1:-1, 1:-1]
        z[i] /= np.sqrt(np.sum(z[i] ** 2))
    return jnp.asarray(z.astype(np.float32))


# ---------------------------------------------------------------------------
# Pallas kernel: operand-swapped matmul + bias + ReLU (the mixing conv)
#   o[F, t] = relu(W[F, Cin] @ Z[Cin, t] + b[F, 1])
# ---------------------------------------------------------------------------
def _mix_kernel(z_ref, w_ref, b_ref, o_ref):
    # bf16 MXU inputs (cast is a cheap VPU op on the VMEM tile; no-op if the
    # activation stream is already bf16), f32 accumulate + bias + ReLU.
    z_bf = z_ref[...].astype(jnp.bfloat16)
    acc = jnp.dot(w_ref[...], z_bf, preferred_element_type=jnp.float32)
    # NOTE: for a ragged last pixel tile the padded lanes hold unspecified
    # data; their relu results are masked on store, so they never reach HBM.
    # Do not add in-kernel reductions over the pixel axis without masking.
    o_ref[...] = jnp.maximum(acc + b_ref[...], 0.0).astype(o_ref.dtype)


def _vmem_capacity_bytes():
    try:
        return int(pltpu.get_tpu_info().vmem_capacity_bytes)
    except Exception:
        return 64 * 1024 * 1024          # conservative v7x floor


def _choose_pixel_tile(N, P, Cin, F, in_bytes, out_bytes, tile_budget):
    """Pick the pixel-tile (lane) size for the streaming grid."""
    def footprint(t):
        return (2 * Cin * t * in_bytes     # double-buffered activation tiles
                + 2 * F * Cin * 2          # resident bf16 weights (x2: conservative)
                + 2 * F * 4                # bias
                + 2 * F * t * out_bytes)   # double-buffered output tiles

    # Largest multiple-of-128 tile that fits the budget (cap 2048 lanes:
    # beyond that the ~0.35us/step overhead is already fully amortized).
    t = 2048
    while t > 128 and footprint(t) > tile_budget:
        t //= 2
    if P <= t:
        t = P                              # full lane dim: always a legal block
        if N == 1 and P >= 256:
            # v7x has 2 TensorCores: make sure the grid has >= 2 steps.
            t = min(P, ((P + 1) // 2 + 127) // 128 * 128)
    return t, footprint(t)


def mixing_conv_relu_nchw(z, wmat, bias, *, out_dtype=jnp.bfloat16):
    """Y[n, f, p] = relu(sum_c wmat[f, c] * z[n, c, p] + bias[f]).

    z: (N, Cin, P) activations in NCHW-flattened layout (bf16 or f32).
    wmat: (F, Cin), bias: (F,).  Returns (N, F, P) in out_dtype.

    Weights + bias are resident in VMEM; z is streamed from HBM exactly once
    over a 2-D ("parallel", "parallel") grid of (batch, pixel tiles).
    """
    N, Cin, P = z.shape
    F_, Cin_w = wmat.shape
    assert Cin_w == Cin

    w_bf = wmat.astype(jnp.bfloat16)
    b2 = bias.astype(jnp.float32).reshape(F_, 1)

    in_bytes = jnp.dtype(z.dtype).itemsize
    out_bytes = jnp.dtype(out_dtype).itemsize

    vmem_cap = _vmem_capacity_bytes()
    t, fp = _choose_pixel_tile(N, P, Cin, F_, in_bytes, out_bytes,
                               tile_budget=vmem_cap // 4)
    vmem_limit = int(min(max(2 * fp, 16 * 1024 * 1024), vmem_cap // 2))

    grid = (N, pl.cdiv(P, t))

    return pl.pallas_call(
        _mix_kernel,
        out_shape=jax.ShapeDtypeStruct((N, F_, P), out_dtype),
        grid_spec=pltpu.PrefetchScalarGridSpec(
            num_scalar_prefetch=0,
            grid=grid,
            in_specs=[
                # streamed activations: (Cin, t) tile of batch n (N dim squeezed)
                pl.BlockSpec((None, Cin, t), lambda n, p: (n, 0, p)),
                # resident weights / bias
                pl.BlockSpec((F_, Cin), lambda n, p: (0, 0)),
                pl.BlockSpec((F_, 1), lambda n, p: (0, 0)),
            ],
            out_specs=pl.BlockSpec((None, F_, t), lambda n, p: (n, 0, p)),
        ),
        compiler_params=pltpu.CompilerParams(
            dimension_semantics=("parallel", "parallel"),
            vmem_limit_bytes=vmem_limit),
    )(z, w_bf, b2)


# ---------------------------------------------------------------------------
# The module
# ---------------------------------------------------------------------------
class Scattering2DMixed:
    def __init__(self, in_channels, J, shape, max_order, L=8, k=1, alpha=None,
                 key=None, out_dtype=jnp.bfloat16):
        if k > 1 and alpha is not None:
            raise ValueError('Only use alpha when k=1')
        self.J, self.L, self.max_order = J, L, max_order
        self.shape = shape
        self.out_dtype = out_dtype          # kernel output dtype (bf16 halves writes)
        phi_f, psi_f = build_scattering_filters(shape[0], shape[1], J, L)
        self.phi_f = jnp.asarray(phi_f)
        self.psi_f = {kk: jnp.asarray(v) for kk, v in psi_f.items()}

        if max_order >= 2:
            K = 1 + J * L + (L ** 2) * J * (J - 1) // 2
        else:
            K = 1 + J * L
        C = in_channels * K                 # channels_after_scat
        self.out_channels = C

        key = jax.random.PRNGKey(0) if key is None else key
        # deterministic stand-ins for torch.randn / zeros parameters
        self.A = jax.random.normal(key, (C, C, k, k), jnp.float32)
        self.b = jnp.zeros((C,), jnp.float32)

        if alpha == 'impulse':
            self.alpha = random_postconv_impulse(C, C)
            self.pad = 1
        elif alpha == 'smooth':
            self.alpha = random_postconv_smooth(C, C, sigma=1)
            self.pad = 1
        elif alpha == 'random':
            fan_in, fan_out = C * 9, C * 9
            bound = np.sqrt(6.0 / (fan_in + fan_out))
            self.alpha = jnp.asarray(
                np.random.uniform(-bound, bound, size=(C, C, 3, 3)).astype(np.float32))
            self.pad = 1
        elif alpha is None:
            self.alpha = jnp.float32(1.0)
            self.pad = (k - 1) // 2
        else:
            raise ValueError

    def init(self, gain=1.0):
        F_, C, kh, kw = self.A.shape
        fan_in, fan_out = C * kh * kw, F_ * kh * kw
        bound = gain * np.sqrt(6.0 / (fan_in + fan_out))
        self.A = jax.random.uniform(jax.random.PRNGKey(1), self.A.shape,
                                    jnp.float32, -bound, bound)

    def __call__(self, x):
        # scattering front-end (plain JAX / XLA FFT), coefficients stored bf16
        z = scattering2d(x, self.J, self.L, self.max_order,
                         self.phi_f, self.psi_f, out_dtype=jnp.bfloat16)
        N = z.shape[0]
        z = z.reshape(N, -1, z.shape[-2], z.shape[-1])        # (N, Cz, H', W')
        Cz, H, W = z.shape[1], z.shape[2], z.shape[3]

        As = self.A * self.alpha                               # (F, Cz, kk, kk)
        F_, _, kk, _ = As.shape
        pad = self.pad

        if kk == 1:
            # 1x1 mixing: NCHW is consumed directly; only a free flatten.
            z_in = z.reshape(N, Cz, H * W)
            wmat = As.reshape(F_, Cz)
        else:
            # TODO(synk): fold the kk*kk taps into the Pallas kernel (resident
            # spatially-padded z block + per-tap shifted slices with in-kernel
            # accumulation) instead of materializing the kk^2-larger im2col
            # patches array in HBM.
            zp = jnp.pad(z, ((0, 0), (0, 0), (pad, pad), (pad, pad)))
            cols = [zp[:, :, dy:dy + H, dx:dx + W]
                    for dy in range(kk) for dx in range(kk)]
            patches = jnp.stack(cols, axis=2)                  # (N, Cz, kk*kk, H, W)
            z_in = patches.reshape(N, Cz * kk * kk, H * W)
            wmat = As.reshape(F_, Cz * kk * kk)

        # hot path in Pallas: matmul + bias + relu, NCHW in / NCHW out
        y = mixing_conv_relu_nchw(z_in, wmat, self.b, out_dtype=self.out_dtype)
        return y.reshape(N, F_, H, W)                          # free reshape


# ---------------------------------------------------------------------------
if __name__ == "__main__":
    np.random.seed(0)
    key = jax.random.PRNGKey(0)
    kx, kp = jax.random.split(key)

    N, C_in, H, W = 2, 2, 32, 32
    J, L, max_order = 2, 4, 2

    x = jax.random.normal(kx, (N, C_in, H, W), jnp.float32)
    mod = Scattering2DMixed(C_in, J=J, shape=(H, W), max_order=max_order,
                            L=L, k=1, alpha=None, key=kp)

    y = mod(x)
    y = jax.block_until_ready(y)
    y_f = jnp.asarray(y, jnp.float32)

    # reference check of the mixing conv + relu against lax.conv (f32)
    z = scattering2d(x, J, L, max_order, mod.phi_f, mod.psi_f,
                     out_dtype=jnp.float32)
    z = z.reshape(N, -1, z.shape[-2], z.shape[-1])
    As = mod.A * mod.alpha
    y_ref = lax.conv_general_dilated(
        z, As, window_strides=(1, 1),
        padding=[(mod.pad, mod.pad), (mod.pad, mod.pad)],
        dimension_numbers=("NCHW", "OIHW", "NCHW"))
    y_ref = jnp.maximum(y_ref + mod.b[None, :, None, None], 0.0)

    assert y.shape == (N, mod.out_channels, H // 2 ** J, W // 2 ** J), y.shape
    assert np.isfinite(np.asarray(y_f)).all()
    err = float(jnp.max(jnp.abs(y_f - y_ref)))
    scale = float(jnp.max(jnp.abs(y_ref))) + 1.0
    assert err <= 5e-2 * scale, f"mismatch: {err} (scale {scale})"

    print("KERNEL_OK")
</pallas_src>

<mosaic_0001>
module attributes {stable_mosaic.version = 11 : i64} {
  func.func @_mix_kernel(%arg0: i32, %arg1: i32, %arg2: memref<1x50x64xbf16, #tpu.memory_space<vmem>>, %arg3: memref<50x50xbf16, #tpu.memory_space<vmem>>, %arg4: memref<50x1xf32, #tpu.memory_space<vmem>>, %arg5: memref<1x50x64xbf16, #tpu.memory_space<vmem>>) attributes {dimension_semantics = [#tpu.dimension_semantics<parallel>, #tpu.dimension_semantics<parallel>], iteration_bounds = array<i64: 2, 1>, scalar_prefetch = 0 : i64, scratch_operands = 0 : i64, tpu.core_type = #tpu.core_type<tc>, window_params = [{transform_indices = @transform_0, window_bounds = array<i64: 1, 50, 64>}, {pipeline_mode = #tpu.pipeline_mode<synchronous>, transform_indices = @transform_1, window_bounds = array<i64: 50, 50>}, {pipeline_mode = #tpu.pipeline_mode<synchronous>, transform_indices = @transform_2, window_bounds = array<i64: 50, 1>}, {transform_indices = @transform_3, window_bounds = array<i64: 1, 50, 64>}]} {
    %c0 = arith.constant 0 : index
    %c0_0 = arith.constant 0 : index
    %c0_1 = arith.constant 0 : index
    %0 = vector.load %arg2[%c0, %c0_0, %c0_1] : memref<1x50x64xbf16, #tpu.memory_space<vmem>>, vector<1x50x64xbf16>
    %1 = vector.shape_cast %0 : vector<1x50x64xbf16> to vector<50x64xbf16>
    %c0_2 = arith.constant 0 : index
    %c0_3 = arith.constant 0 : index
    %2 = vector.load %arg3[%c0_2, %c0_3] : memref<50x50xbf16, #tpu.memory_space<vmem>>, vector<50x50xbf16>
    %cst = arith.constant dense<0.000000e+00> : vector<50x64xf32>
    %3 = tpu.matmul %2, %1, %cst {dimension_numbers = #tpu.dot_dimension_numbers<[1], [0], [0], [1], [0, 0, 1, 1], [], []>} : vector<50x50xbf16>, vector<50x64xbf16>, vector<50x64xf32> -> vector<50x64xf32>
    %c0_4 = arith.constant 0 : index
    %c0_5 = arith.constant 0 : index
    %4 = vector.load %arg4[%c0_4, %c0_5] : memref<50x1xf32, #tpu.memory_space<vmem>>, vector<50x1xf32>
    %5 = vector.broadcast %4 : vector<50x1xf32> to vector<50x64xf32>
    %6 = arith.addf %3, %5 : vector<50x64xf32>
    %cst_6 = arith.constant 0.000000e+00 : f32
    %7 = vector.broadcast %cst_6 : f32 to vector<50x64xf32>
    %8 = arith.maximumf %6, %7 : vector<50x64xf32>
    %9 = arith.truncf %8 : vector<50x64xf32> to vector<50x64xbf16>
    %c0_7 = arith.constant 0 : index
    %c0_8 = arith.constant 0 : index
    %c0_9 = arith.constant 0 : index
    %10 = vector.load %arg5[%c0_7, %c0_8, %c0_9] : memref<1x50x64xbf16, #tpu.memory_space<vmem>>, vector<1x50x64xbf16>
    %11 = vector.shape_cast %10 : vector<1x50x64xbf16> to vector<50x64xbf16>
    %12 = vector.shape_cast %9 : vector<50x64xbf16> to vector<1x50x64xbf16>
    tpu.vector_store %arg5[%c0_7, %c0_8, %c0_9], %12 {strides = array<i32>} : memref<1x50x64xbf16, #tpu.memory_space<vmem>>, vector<1x50x64xbf16>,
    return
  }
  func.func @transform_0(%arg0: i32, %arg1: i32) -> (i32, i32, i32) {
    %c0_i32 = arith.constant 0 : i32
    %c0_i32_0 = arith.constant 0 : i32
    return %arg0, %c0_i32, %arg1 : i32, i32, i32
  }
  func.func @transform_1(%arg0: i32, %arg1: i32) -> (i32, i32) {
    %c0_i32 = arith.constant 0 : i32
    %c0_i32_0 = arith.constant 0 : i32
    %c0_i32_1 = arith.constant 0 : i32
    return %c0_i32, %c0_i32_0 : i32, i32
  }
  func.func @transform_2(%arg0: i32, %arg1: i32) -> (i32, i32) {
    %c0_i32 = arith.constant 0 : i32
    %c0_i32_0 = arith.constant 0 : i32
    %c0_i32_1 = arith.constant 0 : i32
    return %c0_i32, %c0_i32_0 : i32, i32
  }
  func.func @transform_3(%arg0: i32, %arg1: i32) -> (i32, i32, i32) {
    %c0_i32 = arith.constant 0 : i32
    %c0_i32_0 = arith.constant 0 : i32
    return %arg0, %c0_i32, %arg1 : i32, i32, i32
  }
}

</mosaic_0001>

<bundles_post_ra>
// kernel: tpu_custom_call.1
= control target key start
LH: loop header
LB: loop body
LE: loop exit
PB: predicated region body
PF: predicated region fallthrough
CT: control target
= control target key end

     0   :  { %s657_s12 = smov 0   ;;  %s659_s13 = smov 0   ;;  %s741_s0 = inlined_call_operand.vmem [shape: bf16[2,50,64], index: 0, kind: input, shape index: {}]   ;;  %s742_s1 = inlined_call_operand.vmem [shape: bf16[50,50], index: 1, kind: input, shape index: {}]   ;;  %s743_s2 = inlined_call_operand.vmem [shape: f32[50,1], index: 2, kind: input, shape index: {}]   ;;  %s744_s3 = inlined_call_operand.vmem [shape: bf16[2,50,64], index: 3, kind: output, shape index: {}]  }
   0x1   :  { %s661_s14 = smov 0  }
   0x2 LB: > { %s25_s15 = sadd.s32 1, %s630_s13  ;;  %p511_p0 = scmp.ge.s32.totalorder %s634_s14, 1  ;;  %s634_s14 = sphi %s661_s14, %s13_s14   ;;  %s630_s13 = sphi %s659_s13, %s746_s13   ;;  %s626_s12 = sphi %s657_s12, %s745_s12  }
   0x3   : > { %p27_p1 = scmp.ge.s32.totalorder %s25_s15, 2  ;;  %p156_p2 = scmp.lt.s32.totalorder %s634_s14, 3 }
   0x5   : > { %s748_s15 = smov (%p27_p1, %s25_s15), 0  ;;  %p157_p3 = pnand %p511_p0, %p156_p2 }
   0x6   : > { %p186_p4 = scmp.lt.s32.totalorder (!%p157_p3), %s626_s12, 1  ;;  %v608_v0 = vld [vmem:[%s742_s1] sm:$0xff] (!%p157_p3)   ;;  %vm298_vm0 = vcmask (!%p157_p3), 408576   ;;  %v609_v1 = vld [vmem:[%s742_s1 + $0x10] sm:$0xff] (!%p157_p3)   ;;  %v636_v4 = vmov (!%p157_p3), 0   ;;  %v218_v6 = vld [vmem:[%s743_s2 + $0x8] sm:$0xff] (!%p157_p3) }
   0x7   : > { %160 = sbr.rel (%p157_p3) target bundleno = 258 (0x102), region = 32  ;;  %558 = vmatprep.mubr.msk.bf16.mxu0 (!%p157_p3), %vm298_vm0, %v608_v0  ;;  %562 = vmatprep.mubr.msk.bf16.mxu1 (!%p157_p3), %vm298_vm0, %v609_v1  ;;  %v217_v2 = vld [vmem:[%s743_s2] sm:$0xff] (!%p157_p3)  ;;  %v219_v3 = vld [vmem:[%s743_s2 + $0x10] sm:$0xff] (!%p157_p3)  ;;  %v220_v8 = vld [vmem:[%s743_s2 + $0x18] sm:$0xff] (!%p157_p3)  ;;  %vm311_vm1 = vcmask (!%p157_p3), 1040384   ;;  %vm415_vm2 = vcmask (!%p157_p3), 519168  }
   0x8   : > { %602 = vset.pattern.permute.xlu0 (!%p157_p3), %v636_v4  ;;  %603 = vset.pattern.permute.xlu1 (!%p157_p3), %v636_v4  ;;  %v221_v10 = vld [vmem:[%s743_s2 + $0x20] sm:$0xff] (!%p157_p3)  ;;  %v222_v11 = vld [vmem:[%s743_s2 + $0x28] sm:$0xff] (!%p157_p3)  ;;  %v223_v13 = vld [vmem:[%s743_s2 + $0x30] sm:$0x3] (!%p157_p3)  ;;  %vm422_vm3 = vcmask (!%p157_p3), 516096  }
   0x9   : > { %226 = vperm.xlu0 (!%p157_p3), %602, %v217_v2   ;;  %236 = vperm.xlu1 (!%p157_p3), %603, %v219_v3   ;;  %v610_v15 = vld [vmem:[%s742_s1 + $0x8] sm:$0xff] (!%p157_p3)   ;;  %v611_v16 = vld [vmem:[%s742_s1 + $0x18] ss:$0 sps:$4 sm:$0x11] (!%p157_p3)  }
   0xd   : > { %231 = vperm.xlu0 (!%p157_p3), %602, %v218_v6   ;;  %241 = vperm.xlu1 (!%p157_p3), %603, %v220_v8  }
   0xe   : > { %s750_s12 = smov (!%p186_p4, %s626_s12), 1 }
   0xf   : > { %s576_s20 = smul.u32 28, %s750_s12 }
  0x11   : > { %s193_s27 = scalar_lea.vmem %s741_s0, %s576_s20  ;;  %246 = vperm.xlu0 %602, %v221_v10   ;;  %251 = vperm.xlu1 %603, %v222_v11   ;;  %s201_s22 = scalar_lea.vmem %s744_s3, %s576_s20 }
  0x12   : > { %v604_v5 = vld [vmem:[%s193_s27] sm:$0xff]   ;;  %v605_v7 = vld [vmem:[%s193_s27 + $0x8] sm:$0xff]   ;;  %v606_v9 = vld [vmem:[%s193_s27 + $0x10] sm:$0xff]  }
  0x13   : > { %550 = vmatprep.subr.bf16.mxu0 %v604_v5  ;;  %566 = vmatprep.subr.bf16.mxu1 %v604_v5  ;;  %v607_v12 = vld [vmem:[%s193_s27 + $0x18] ss:$0 sps:$4 sm:$0x11]  }
  0x14   : > { %551 = vmatpush3.bf16.msra.mxu0 %v604_v5  ;;  %570 = vmatpush3.bf16.msra.mxu1 %v604_v5  ;;  %v313_v14 = vsel %vm311_vm1, %v607_v12, 0 }
  0x15   : > { %552 = vmatprep.subr.bf16.mxu0 %v605_v7  ;;  %567 = vmatprep.subr.bf16.mxu1 %v605_v7 }
  0x16   : > { %256 = vperm.xlu0 %602, %v223_v13  }
  0x18   : > { %553 = vmatpush3.bf16.msra.mxu0 %v605_v7  ;;  %571 = vmatpush3.bf16.msra.mxu1 %v605_v7 }
  0x19   : > { %554 = vmatprep.subr.bf16.mxu0 %v606_v9  ;;  %568 = vmatprep.subr.bf16.mxu1 %v606_v9 }
  0x1c   : > { %555 = vmatpush3.bf16.msra.mxu0 %v606_v9  ;;  %572 = vmatpush3.bf16.msra.mxu1 %v606_v9 }
  0x1d   : > { %574 = vmatprep.subr.msk.bf16.mxu0 %vm311_vm1, %v607_v12  ;;  %575 = vmatprep.subr.msk.bf16.mxu1 %vm311_vm1, %v607_v12 }
  0x20   : > { %557 = vmatpush3.bf16.msra.mxu0 %v313_v14  ;;  %573 = vmatpush3.bf16.msra.mxu1 %v313_v14 }
  0x23   : > { %559 = vmatmul.mubr.msk.bf16.vlgmr.msra.gmra.mrb[0].mxu0 %vm298_vm0, %v610_v15  ;;  %563 = vmatmul.mubr.msk.bf16.vlgmr.msra.gmra.mrb[0].mxu1 %vm298_vm0, %v611_v16 }
  0x88   : > { %v227_v17 = vpop.permute.xlu0 %226  ;;  %v237_v19 = vpop.permute.xlu1 %236 }
  0x8c   : > { %v232_v18 = vpop.permute.xlu0 %231  ;;  %v242_v21 = vpop.permute.xlu1 %241 }
  0x90   : > { %v247_v20 = vpop.permute.xlu0 %246  ;;  %v252_v23 = vpop.permute.xlu1 %251 }
  0x95   : > { %v257_v22 = vpop.permute.xlu0 %256 }
  0xf6   : > { %v560_v24 = vpop.f32.mrb[0].mxu0  ;;  %v564_v25 = vpop.f32.mrb[0].mxu1 }
  0xf7   : > { %v358_v26 = vadd.f32 %v560_v24, %v237_v19  ;;  %v374_v27 = vadd.f32 %v564_v25, %v257_v22  ;;  %v349_v28 = vpop.f32.mrb[1].mxu0  ;;  %v365_v29 = vpop.f32.mrb[1].mxu1 }
  0xf8   : > { %v350_v30 = vadd.f32 %v349_v28, %v227_v17  ;;  %v366_v31 = vadd.f32 %v365_v29, %v247_v20  ;;  %v561_v32 = vpop.f32.mrb[2].mxu0  ;;  %v565_v33 = vpop.f32.mrb[2].mxu1 }
  0xf9   : > { %v381_v34 = vmax.f32 %v358_v26, 0.0  ;;  %v385_v35 = vmax.f32 %v374_v27, 0.0  ;;  %v361_v36 = vadd.f32 %v561_v32, %v242_v21  ;;  %v352_v37 = vpop.f32.mrb[3].mxu0  ;;  %v368_v38 = vpop.f32.mrb[3].mxu1 }
  0xfa   : > { %v379_v39 = vmax.f32 %v350_v30, 0.0  ;;  %v383_v40 = vmax.f32 %v366_v31, 0.0  ;;  %v353_v41 = vadd.f32 %v352_v37, %v232_v18  ;;  %v369_v42 = vadd.f32 %v368_v38, %v252_v23 }
  0xfb   : > { %v537_v43 = vpack.c.bf16 %v381_v34, %v381_v34  ;;  %v541_v44 = vpack.c.bf16 %v385_v35, %v385_v35  ;;  %v382_v45 = vmax.f32 %v361_v36, 0.0 }
  0xfc   : > { %v535_v46 = vpack.c.bf16 %v379_v39, %v379_v39  ;;  %v539_v47 = vpack.c.bf16 %v383_v40, %v383_v40  ;;  %v380_v48 = vmax.f32 %v353_v41, 0.0  ;;  %v384_v49 = vmax.f32 %v369_v42, 0.0 }
  0xfd   : > { %418 = vst.msk [vmem:[%s201_s22 + $0x8] sm:$0xf] %vm415_vm2, %v537_v43  ;;  %v538_v50 = vpack.c.bf16 %v382_v45, %v382_v45 }
  0xfe   : > { %423 = vst.msk [vmem:[%s201_s22 + $0x18] sm:$0x1] %vm422_vm3, %v541_v44  ;;  %v536_v51 = vpack.c.bf16 %v380_v48, %v380_v48  ;;  %v540_v52 = vpack.c.bf16 %v384_v49, %v384_v49 }
  0xff   : > { %416 = vst.msk [vmem:[%s201_s22] sm:$0xf] %vm415_vm2, %v535_v46  ;;  %420 = vst.msk [vmem:[%s201_s22 + $0x10] sm:$0xf] %vm415_vm2, %v539_v47 }
 0x100   : > { %419 = vst.msk [vmem:[%s201_s22 + $0xc] sm:$0xf] %vm415_vm2, %v538_v50  ;;  %417 = vst.msk [vmem:[%s201_s22 + $0x4] sm:$0xf] %vm415_vm2, %v536_v51 }
 0x101   : > { %421 = vst.msk [vmem:[%s201_s22 + $0x14] sm:$0xf] %vm415_vm2, %v540_v52 }
 0x102 PF: > { %s13_s14 = sadd.s32 1, %s634_s14   ;;  %s745_s12 = smov %s630_s13 }
 0x103   : > { %p10_p5 = scmp.ge.s32.totalorder %s13_s14, 4   ;;  %s746_s13 = smov %s748_s15 }
 0x105   :  { %12 = sbr.rel (!%p10_p5) target bundleno = 2 (0x2), region = 62 }

</bundles_post_ra>
